<compile_context>
chip_gen: v7x
topology: tpu7x:2x2x1
jax: 0.10.0
libtpu: 0.0.40
codegen_flags: <defaults>
</compile_context>

<pallas_src>
import numpy as np
import jax
import jax.numpy as jnp
from jax import lax
from jax.experimental import pallas as pl
from jax.experimental.pallas import tpu as pltpu


def _round_up(v, m):
    return (v + m - 1) // m * m


# ---------------------------------------------------------------------------
# Pallas kernel 1: ConvTranspose2d(k=2, s=2) as lane-dense matmuls.
#
# Grid = (row-tiles, dy).  Each step multiplies a (TB*W, CX) block of input
# pixels by the (CX, 2*CP) weight slab of output-row parity dy (columns are
# ordered (dx, channel)), so the downstream pixel shuffle is a pure reshape.
# ---------------------------------------------------------------------------
def _upconv_kernel(x_ref, w_ref, b_ref, o_ref):
    dy = pl.program_id(1)
    y = jnp.dot(x_ref[...], w_ref[dy], preferred_element_type=jnp.float32)
    o_ref[...] = (y + b_ref[...]).reshape(o_ref.shape)


def _upconv(x_nchw, w_up, b_up, CP):
    """x: (N, Cin, H, W), w_up: (Cin, C, 2, 2) -> up: (N, 2H, 2W, CP) NHWC."""
    f32 = jnp.float32
    N, Cin, H, W = x_nchw.shape
    C = b_up.shape[0]
    CX = _round_up(Cin, 128)

    m8 = int(8 // np.gcd(W, 8))                 # keep TB*W a multiple of 8
    TB = max(1, min(H, max(1, 512 // W)))
    TB = int(_round_up(TB, m8))
    HB = -(-H // TB)
    Hp = HB * TB

    x_nhwc = jnp.transpose(x_nchw, (0, 2, 3, 1)).astype(f32)
    x2 = jnp.pad(x_nhwc, ((0, 0), (0, Hp - H), (0, 0), (0, CX - Cin)))
    x2 = x2.reshape(N * Hp * W, CX)

    # per-parity weights, columns ordered (dx, out-channel)
    wt = jnp.transpose(w_up, (2, 0, 3, 1)).astype(f32)            # (dy,in,dx,out)
    wt = jnp.pad(wt, ((0, 0), (0, CX - Cin), (0, 0), (0, CP - C)))
    wt = wt.reshape(2, CX, 2 * CP)
    bt = jnp.tile(jnp.pad(b_up.astype(f32), (0, CP - C)), 2)[None, :]  # (1, 2CP)

    out = pl.pallas_call(
        _upconv_kernel,
        out_shape=jax.ShapeDtypeStruct((N * Hp, 2, W, 2 * CP), f32),
        grid_spec=pltpu.PrefetchScalarGridSpec(
            num_scalar_prefetch=0,
            grid=(N * HB, 2),
            in_specs=[
                pl.BlockSpec((TB * W, CX), lambda m, dy: (m, 0)),
                pl.BlockSpec((2, CX, 2 * CP), lambda m, dy: (0, 0, 0)),
                pl.BlockSpec((1, 2 * CP), lambda m, dy: (0, 0)),
            ],
            out_specs=pl.BlockSpec((TB, 1, W, 2 * CP),
                                   lambda m, dy: (m, dy, 0, 0)),
        ),
        compiler_params=pltpu.CompilerParams(
            dimension_semantics=("parallel", "arbitrary"),
            vmem_limit_bytes=32 * 1024 * 1024),
    )(x2, wt, bt)

    # pixel shuffle is a pure reshape in this layout (no transpose pass)
    up = out.reshape(N, Hp, 2, W, 2, CP)[:, :H]
    return up.reshape(N, 2 * H, 2 * W, CP)


# ---------------------------------------------------------------------------
# Pallas kernel 2: fused DoubleConv (conv3x3+BN+ReLU -> conv3x3+BN+ReLU)
#
# Layout: activations are row-flattened NHWC on a spatially padded grid of
# width WP = W2 + 4 (2 zero columns each side) and RP = H2p + 6 rows (3 zero
# rows each side + bottom tiling round-up), i.e. HBM arrays of shape
# (N, RP*WP, Cpad).  A conv tap (kh, kw) is then just a row-shift of
# (kh+1)*WP + (kw-1) in the flattened layout.
#
# Each grid step (n, t) processes TH real output rows: it DMAs a halo'd
# window of TH+6 grid rows of `skip` and `up` into VMEM (double-buffered),
# computes conv1 on TH+2 rows (the conv2 halo), masks it to zero outside the
# real image, keeps it in a VMEM scratch, computes conv2 on TH rows and writes
# one lane-dense (TH*WP, Cpad) output block.  BN scale + conv bias are folded
# into the weights / shifts on the host.
# ---------------------------------------------------------------------------
def _make_doubleconv_kernel(N, NT, TH, WP, H2, W2, CP):
    LWIN = (TH + 6) * WP         # input window rows (flattened)
    M1 = (TH + 2) * WP           # conv1 output rows (flattened)
    M2 = TH * WP                 # conv2 output rows (flattened)
    TAPS = [(kh, kw) for kh in range(3) for kw in range(3)]

    def kernel(skip_hbm, up_hbm, w1s_ref, w1u_ref, w2_ref,
               sh1_ref, sh2_ref, out_ref, skip_buf, up_buf, y1_buf, sem):
        n = pl.program_id(0)
        t = pl.program_id(1)
        slot = (n * NT + t) % 2

        def copies(nn, tt, sl):
            row0 = tt * (TH * WP)
            c_s = pltpu.make_async_copy(
                skip_hbm.at[nn, pl.ds(row0, LWIN)], skip_buf.at[sl],
                sem.at[0, sl])
            c_u = pltpu.make_async_copy(
                up_hbm.at[nn, pl.ds(row0, LWIN)], up_buf.at[sl],
                sem.at[1, sl])
            return c_s, c_u

        is_first = jnp.logical_and(n == 0, t == 0)
        is_last = jnp.logical_and(n == N - 1, t == NT - 1)

        @pl.when(is_first)
        def _():
            # one-time: zero guard bands of the conv1 scratch + first DMA
            y1_buf[0:WP, :] = jnp.zeros((WP, CP), jnp.float32)
            y1_buf[(TH + 3) * WP:(TH + 4) * WP, :] = jnp.zeros((WP, CP),
                                                               jnp.float32)
            for c in copies(n, t, slot):
                c.start()

        # wait for this tile's input windows
        for c in copies(n, t, slot):
            c.wait()

        # prefetch the next tile's windows into the other slot
        @pl.when(jnp.logical_not(is_last))
        def _():
            wrap = (t + 1) == NT
            nn = jnp.where(wrap, n + 1, n)
            tt = jnp.where(wrap, 0, t + 1)
            for c in copies(nn, tt, 1 - slot):
                c.start()

        # ----- conv1 (+bias+BN folded) + ReLU: 9 shifted matmuls x 2 --------
        acc = jnp.zeros((M1, CP), jnp.float32)
        for k, (kh, kw) in enumerate(TAPS):
            off = (kh + 1) * WP + (kw - 1)           # static row shift
            acc = acc + jnp.dot(skip_buf[slot, pl.ds(off, M1), :],
                                w1s_ref[k], preferred_element_type=jnp.float32)
            acc = acc + jnp.dot(up_buf[slot, pl.ds(off, M1), :],
                                w1u_ref[k], preferred_element_type=jnp.float32)
        y1 = jnp.maximum(acc + sh1_ref[...], 0.0)

        # zero y1 outside the real image so conv2 sees proper zero padding
        fi = lax.broadcasted_iota(jnp.int32, (M1, 1), 0)
        r = fi // WP
        col = fi - r * WP
        real_row = t * TH + r - 1
        ok = jnp.logical_and(
            jnp.logical_and(real_row >= 0, real_row < H2),
            jnp.logical_and(col >= 2, col < 2 + W2))
        y1 = jnp.where(ok, y1, 0.0)

        # stash y1 (guard bands already zero) in VMEM; it never touches HBM
        y1_buf[WP:WP + M1, :] = y1

        # ----- conv2 (+bias+BN folded) + ReLU --------------------------------
        acc2 = jnp.zeros((M2, CP), jnp.float32)
        for k, (kh, kw) in enumerate(TAPS):
            off = (kh + 1) * WP + (kw - 1)
            acc2 = acc2 + jnp.dot(y1_buf[pl.ds(off, M2), :], w2_ref[k],
                                  preferred_element_type=jnp.float32)
        out_ref[0] = jnp.maximum(acc2 + sh2_ref[...], 0.0)

    return kernel


# ---------------------------------------------------------------------------
# DecoderStep.forward(x, skip_con): NCHW in, NCHW out.
# ---------------------------------------------------------------------------
def decoder_step(x_nchw, skip_nchw, p, eps=1e-5):
    f32 = jnp.float32
    N, Cin, H, W = x_nchw.shape
    C = p["b_up"].shape[0]
    H2, W2 = 2 * H, 2 * W
    assert skip_nchw.shape == (N, C, H2, W2)

    CP = _round_up(C, 128)        # lane-padded output channels

    # --- ConvTranspose2d(k=2, s=2) -> up in NHWC, lane-padded ---------------
    up = _upconv(x_nchw, p["w_up"], p["b_up"], CP)       # (N, H2, W2, CP)

    # --- skip in NHWC --------------------------------------------------------
    skip_nhwc = jnp.transpose(skip_nchw, (0, 2, 3, 1)).astype(f32)

    # --- tiling geometry (adapt TH so halo windows fit VMEM) -----------------
    WP = W2 + 4                               # padded grid width
    win_row_bytes = 16 * WP * CP              # 2 arrays * 2 slots * 4B per row
    th_budget = max(4, (24 * 1024 * 1024) // win_row_bytes - 6)
    TH = int(min(H2, 64, th_budget))
    if TH < H2:
        TH = max(4, (TH // 4) * 4)            # keep tile rows (8,128)-aligned
    NT = -(-H2 // TH)
    H2p = NT * TH
    RP = H2p + 6                              # padded grid rows
    LWIN = (TH + 6) * WP
    M2 = TH * WP

    def pad_flatten(a, cpad):                 # (N,H2,W2,c) -> (N, RP*WP, CP)
        a = jnp.pad(a, ((0, 0), (3, RP - 3 - H2), (2, 2), (0, cpad)))
        return a.reshape(N, RP * WP, CP)

    skip_f = pad_flatten(skip_nhwc, CP - C)   # one pad op: channels + spatial
    up_f = pad_flatten(up, 0)

    # --- conv weights (per-tap slabs) with conv-bias + BN folded in ----------
    def bn_fold(bias, gamma, beta, mean, var):
        scale = (gamma / jnp.sqrt(var + eps)).astype(f32)
        shift = ((bias - mean) * scale + beta).astype(f32)
        return scale, jnp.pad(shift, (0, CP - C))[None, :]

    sc1, sh1 = bn_fold(p["b1"], p["g1"], p["beta1"], p["m1"], p["v1"])
    sc2, sh2 = bn_fold(p["b2"], p["g2"], p["beta2"], p["m2"], p["v2"])

    def conv_taps(w_oihw, lo, hi, scale):
        taps = []
        for kh in range(3):
            for kw in range(3):
                wt = jnp.transpose(w_oihw[:, lo:hi, kh, kw]).astype(f32)
                wt = wt * scale[None, :]                         # fold BN scale
                wt = jnp.pad(wt, ((0, CP - (hi - lo)), (0, CP - C)))
                taps.append(wt)
        return jnp.stack(taps, axis=0)                           # (9, CP, CP)

    w1s = conv_taps(p["w1"], 0, C, sc1)       # conv1 weights, skip half
    w1u = conv_taps(p["w1"], C, 2 * C, sc1)   # conv1 weights, upsampled half
    w2t = conv_taps(p["w2"], 0, C, sc2)

    # --- fused DoubleConv pallas_call ----------------------------------------
    kernel = _make_doubleconv_kernel(N, NT, TH, WP, H2, W2, CP)
    vmem_bytes = 4 * (2 * 2 * LWIN * CP          # double-buffered halo windows
                      + (TH + 4) * WP * CP       # conv1 scratch
                      + 2 * M2 * CP              # output block (double-buffer)
                      + 2 * 27 * CP * CP         # weight slabs
                      + 4 * CP) + (6 << 20)
    vmem_bytes = int(min(max(vmem_bytes, 16 << 20), 64 << 20))

    out_f = pl.pallas_call(
        kernel,
        out_shape=jax.ShapeDtypeStruct((N, H2p * WP, CP), f32),
        grid_spec=pltpu.PrefetchScalarGridSpec(
            num_scalar_prefetch=0,
            grid=(N, NT),
            in_specs=[
                pl.BlockSpec(memory_space=pl.ANY),    # skip (manual halo DMA)
                pl.BlockSpec(memory_space=pl.ANY),    # up   (manual halo DMA)
                pl.BlockSpec((9, CP, CP), lambda n, t: (0, 0, 0)),
                pl.BlockSpec((9, CP, CP), lambda n, t: (0, 0, 0)),
                pl.BlockSpec((9, CP, CP), lambda n, t: (0, 0, 0)),
                pl.BlockSpec((1, CP), lambda n, t: (0, 0)),
                pl.BlockSpec((1, CP), lambda n, t: (0, 0)),
            ],
            out_specs=pl.BlockSpec((1, M2, CP), lambda n, t: (n, t, 0)),
            scratch_shapes=[
                pltpu.VMEM((2, LWIN, CP), f32),        # skip windows (2 slots)
                pltpu.VMEM((2, LWIN, CP), f32),        # up windows (2 slots)
                pltpu.VMEM(((TH + 4) * WP, CP), f32),  # conv1 output (VMEM only)
                pltpu.SemaphoreType.DMA((2, 2)),
            ]),
        compiler_params=pltpu.CompilerParams(
            dimension_semantics=("arbitrary", "arbitrary"),
            vmem_limit_bytes=vmem_bytes),
    )(skip_f, up_f, w1s, w1u, w2t, sh1, sh2)

    out = out_f.reshape(N, H2p, WP, CP)[:, :H2, 2:2 + W2, :C]
    return jnp.transpose(out, (0, 3, 1, 2))


# ---------------------------------------------------------------------------
# Pure-JAX reference (lax convolutions) for validation
# ---------------------------------------------------------------------------
def reference(x, skip, p, eps=1e-5):
    N, Cin, H, W = x.shape
    Cout = p["b_up"].shape[0]
    up = jnp.einsum("nchw,ckyx->nkhywx", x, p["w_up"]).reshape(
        N, Cout, 2 * H, 2 * W)
    up = up + p["b_up"][None, :, None, None]
    cat = jnp.concatenate([skip, up], axis=1)

    def cbr(z, w, b, g, be, m, v):
        z = lax.conv_general_dilated(z, w, (1, 1), ((1, 1), (1, 1)),
                                     dimension_numbers=("NCHW", "OIHW", "NCHW"))
        z = z + b[None, :, None, None]
        z = (g[None, :, None, None] * (z - m[None, :, None, None])
             / jnp.sqrt(v + eps)[None, :, None, None] + be[None, :, None, None])
        return jnp.maximum(z, 0.0)

    y = cbr(cat, p["w1"], p["b1"], p["g1"], p["beta1"], p["m1"], p["v1"])
    y = cbr(y, p["w2"], p["b2"], p["g2"], p["beta2"], p["m2"], p["v2"])
    return y


# ---------------------------------------------------------------------------
if __name__ == "__main__":
    key = jax.random.PRNGKey(0)
    N, Cin, Cout, H, W = 2, 8, 4, 8, 8  # x: (2,8,8,8), skip: (2,4,16,16)
    ks = jax.random.split(key, 16)
    p = {
        "w_up": 0.1 * jax.random.normal(ks[0], (Cin, Cout, 2, 2), jnp.float32),
        "b_up": 0.1 * jax.random.normal(ks[1], (Cout,), jnp.float32),
        "w1": 0.1 * jax.random.normal(ks[2], (Cout, 2 * Cout, 3, 3), jnp.float32),
        "b1": 0.1 * jax.random.normal(ks[3], (Cout,), jnp.float32),
        "g1": 1.0 + 0.1 * jax.random.normal(ks[4], (Cout,), jnp.float32),
        "beta1": 0.1 * jax.random.normal(ks[5], (Cout,), jnp.float32),
        "m1": 0.1 * jax.random.normal(ks[6], (Cout,), jnp.float32),
        "v1": jax.random.uniform(ks[7], (Cout,), jnp.float32, 0.5, 1.5),
        "w2": 0.1 * jax.random.normal(ks[8], (Cout, Cout, 3, 3), jnp.float32),
        "b2": 0.1 * jax.random.normal(ks[9], (Cout,), jnp.float32),
        "g2": 1.0 + 0.1 * jax.random.normal(ks[10], (Cout,), jnp.float32),
        "beta2": 0.1 * jax.random.normal(ks[11], (Cout,), jnp.float32),
        "m2": 0.1 * jax.random.normal(ks[12], (Cout,), jnp.float32),
        "v2": jax.random.uniform(ks[13], (Cout,), jnp.float32, 0.5, 1.5),
    }
    x = jax.random.normal(ks[14], (N, Cin, H, W), jnp.float32)
    skip = jax.random.normal(ks[15], (N, Cout, 2 * H, 2 * W), jnp.float32)

    out = jax.block_until_ready(decoder_step(x, skip, p))
    assert out.shape == (N, Cout, 2 * H, 2 * W)

    ref = jax.block_until_ready(reference(x, skip, p))
    np.testing.assert_allclose(np.asarray(out), np.asarray(ref),
                               atol=3e-3, rtol=3e-3)
    print("KERNEL_OK")
</pallas_src>

<mosaic_0001>
module attributes {stable_mosaic.version = 11 : i64} {
  func.func @_upconv_kernel(%arg0: i32, %arg1: i32, %arg2: memref<64x128xf32, #tpu.memory_space<vmem>>, %arg3: memref<2x128x256xf32, #tpu.memory_space<vmem>>, %arg4: memref<1x256xf32, #tpu.memory_space<vmem>>, %arg5: memref<8x1x8x256xf32, #tpu.memory_space<vmem>>) attributes {dimension_semantics = [#tpu.dimension_semantics<parallel>, #tpu.dimension_semantics<arbitrary>], iteration_bounds = array<i64: 2, 2>, scalar_prefetch = 0 : i64, scratch_operands = 0 : i64, tpu.core_type = #tpu.core_type<tc>, window_params = [{transform_indices = @transform_0, window_bounds = array<i64: 64, 128>}, {pipeline_mode = #tpu.pipeline_mode<synchronous>, transform_indices = @transform_1, window_bounds = array<i64: 2, 128, 256>}, {pipeline_mode = #tpu.pipeline_mode<synchronous>, transform_indices = @transform_2, window_bounds = array<i64: 1, 256>}, {transform_indices = @transform_3, window_bounds = array<i64: 8, 1, 8, 256>}]} {
    %c0 = arith.constant 0 : index
    %c0_0 = arith.constant 0 : index
    %0 = vector.load %arg2[%c0, %c0_0] : memref<64x128xf32, #tpu.memory_space<vmem>>, vector<64x128xf32>
    %1 = arith.index_cast %arg1 : i32 to index
    %c0_1 = arith.constant 0 : index
    %c0_2 = arith.constant 0 : index
    %2 = vector.load %arg3[%1, %c0_1, %c0_2] : memref<2x128x256xf32, #tpu.memory_space<vmem>>, vector<1x128x256xf32>
    %3 = vector.shape_cast %2 : vector<1x128x256xf32> to vector<128x256xf32>
    %cst = arith.constant dense<0.000000e+00> : vector<64x256xf32>
    %4 = tpu.matmul %0, %3, %cst {dimension_numbers = #tpu.dot_dimension_numbers<[1], [0], [0], [1], [0, 0, 1, 1], [], []>} : vector<64x128xf32>, vector<128x256xf32>, vector<64x256xf32> -> vector<64x256xf32>
    %c0_3 = arith.constant 0 : index
    %c0_4 = arith.constant 0 : index
    %5 = vector.load %arg4[%c0_3, %c0_4] : memref<1x256xf32, #tpu.memory_space<vmem>>, vector<1x256xf32>
    %6 = vector.broadcast %5 : vector<1x256xf32> to vector<64x256xf32>
    %7 = arith.addf %4, %6 : vector<64x256xf32>
    %8 = vector.shape_cast %7 : vector<64x256xf32> to vector<8x1x8x256xf32>
    %c0_5 = arith.constant 0 : index
    %c0_6 = arith.constant 0 : index
    %c0_7 = arith.constant 0 : index
    %c0_8 = arith.constant 0 : index
    %9 = vector.load %arg5[%c0_5, %c0_6, %c0_7, %c0_8] : memref<8x1x8x256xf32, #tpu.memory_space<vmem>>, vector<8x1x8x256xf32>
    tpu.vector_store %arg5[%c0_5, %c0_6, %c0_7, %c0_8], %8 {strides = array<i32>} : memref<8x1x8x256xf32, #tpu.memory_space<vmem>>, vector<8x1x8x256xf32>,
    return
  }
  func.func @transform_0(%arg0: i32, %arg1: i32) -> (i32, i32) {
    %c0_i32 = arith.constant 0 : i32
    %c0_i32_0 = arith.constant 0 : i32
    return %arg0, %c0_i32 : i32, i32
  }
  func.func @transform_1(%arg0: i32, %arg1: i32) -> (i32, i32, i32) {
    %c0_i32 = arith.constant 0 : i32
    %c0_i32_0 = arith.constant 0 : i32
    %c0_i32_1 = arith.constant 0 : i32
    %c0_i32_2 = arith.constant 0 : i32
    return %c0_i32, %c0_i32_0, %c0_i32_1 : i32, i32, i32
  }
  func.func @transform_2(%arg0: i32, %arg1: i32) -> (i32, i32) {
    %c0_i32 = arith.constant 0 : i32
    %c0_i32_0 = arith.constant 0 : i32
    %c0_i32_1 = arith.constant 0 : i32
    return %c0_i32, %c0_i32_0 : i32, i32
  }
  func.func @transform_3(%arg0: i32, %arg1: i32) -> (i32, i32, i32, i32) {
    %c0_i32 = arith.constant 0 : i32
    %c0_i32_0 = arith.constant 0 : i32
    %c0_i32_1 = arith.constant 0 : i32
    return %arg0, %arg1, %c0_i32, %c0_i32_0 : i32, i32, i32, i32
  }
}

</mosaic_0001>

<bundles_post_ra>
// kernel: tpu_custom_call.1
= control target key start
LH: loop header
LB: loop body
LE: loop exit
PB: predicated region body
PF: predicated region fallthrough
CT: control target
= control target key end

     0   :  { %s1273_s0 = inlined_call_operand.hbm [shape: f32[128,128], index: 0, kind: input, shape index: {}]   ;;  %s1274_s1 = inlined_call_operand.hbm [shape: f32[2,128,256], index: 1, kind: input, shape index: {}]   ;;  %s1275_s2 = inlined_call_operand.vmem [shape: f32[1,256], index: 2, kind: input, shape index: {}]   ;;  %s1276_s3 = inlined_call_operand.hbm [shape: f32[16,2,8,256], index: 3, kind: output, shape index: {}]  }
   0x1   :  { %1287 = sst [smem:[#allocation16_spill]] %s1274_s1 }
   0x2   :  { %8 = vsyncpa [#allocation3], 0 }
   0x3   :  { %10 = vsyncpa [#allocation3 + $0x1], 0 }
   0x4   :  { %11 = vsyncpa [#allocation6], 0 }
   0x5   :  { %12 = vsyncpa [#allocation4], 0 }
   0x6   :  { %14 = vsyncpa [#allocation4 + $0x1], 0  ;;  %s930_s12 = smov 0   ;;  %s932_s13 = smov 0  }
   0x7   :  { %s934_s14 = smov 0   ;;  %s936_s15 = smov 0  }
   0x8   :  { %s938_s16 = smov 0   ;;  %s940_s17 = smov 0  }
   0x9   :  { %s942_s18 = smov 0   ;;  %s944_s19 = smov 0  }
   0xa   :  { %s946_s20 = smov 0   ;;  %s948_s21 = smov 0  }
   0xb   :  { %s950_s22 = smov 0  }
   0xc LB: > { %1288 = sst [smem:[#allocation11_spill]] %s857_s12  ;;  %s520_s23 = sadd.s32 4294967295, %s897_s22   ;;  %s897_s22 = sphi %s950_s22, %s20_s22   ;;  %s893_s21 = sphi %s948_s21, %s1319_s21   ;;  %s889_s20 = sphi %s946_s20, %s1310_s20   ;;  %s885_s19 = sphi %s944_s19, %s1318_s19   ;;  %s881_s18 = sphi %s942_s18, %s1309_s18   ;;  %s877_s17 = sphi %s940_s17, %s1317_s17   ;;  %s873_s16 = sphi %s938_s16, %s1316_s16   ;;  %s869_s15 = sphi %s936_s15, %s1315_s15   ;;  %s865_s14 = sphi %s934_s14, %s1314_s14   ;;  %s861_s13 = sphi %s932_s13, %s1313_s13   ;;  %s857_s12 = sphi %s930_s12, %s1312_s12  }
   0xd   : > { %1289 = sst [smem:[#allocation12_spill]] %s889_s20  ;;  %s521_s24 = sadd.s32 4294967294, %s897_s22  }
   0xe   : > { %p52_p0 = scmp.ne.s32.totalorder %s873_s16, %s869_s15  ;;  %p986_p1 = scmp.eq.s32.totalorder %s520_s23, 0 }
   0xf   : > { %s109_s26 = sadd.s32 1, %s865_s14  ;;  %p119_p2 = scmp.ne.s32.totalorder %s865_s14, %s861_s13 }
  0x10   : > { %s1290_s25 = scalar_select %p986_p1, 1, 0 }
  0x11   : > { %p995_p3 = por %p986_p1, %p52_p0  ;;  %p120_p4 = scmp.eq.s32.totalorder %s520_s23, 3 }
  0x12   : > { %p125_p5 = scmp.ne.s32.totalorder %s861_s13, %s857_s12  ;;  %p126_p6 = scmp.eq.s32.totalorder %s521_s24, 3 }
  0x13   : > { %s1291_s27 = scalar_select %p995_p3, 1, 0 }
  0x14   : > { %p1001_p7 = por %p120_p4, %p119_p2  ;;  %p522_p8 = scmp.ge.s32.totalorder %s897_s22, 1 }
  0x15   : > { %p1006_p9 = por %p126_p6, %p125_p5  ;;  %p133_p10 = scmp.lt.s32.totalorder %s897_s22, 5 }
  0x16   : > { %s1292_s28 = scalar_select %p1001_p7, 1, 0 }
  0x17   : > { %s1293_s29 = scalar_select %p1006_p9, 1, 0 }
  0x18   : > { %p1011_p11 = pnand %p522_p8, %p133_p10  ;;  %s899_s4 = smov [#allocation5]  }
  0x19   : > { %1294 = sst [smem:[#allocation13_spill]] %s1293_s29  ;;  %s145_s5 = sshll.u32 %s899_s4, 4  ;;  %s146_s5 = int_to_ptr.vmem [resolvable:$true] %s145_s5 }
  0x1a   : > { %s1295_s30 = scalar_select %p1011_p11, 1, 0 }
  0x1b   : > { %p600_p12 = pneg %p1011_p11  ;;  %s1297_s1 = sld [smem:[#allocation16_spill]] }
  0x1d   : > { %p1019_p13 = pnand %p600_p12, %p986_p1 }
  0x1f   : > { %p715_p2 = pneg %p1019_p13 }
  0x21   : > { %s713_s9 = scalar_lea.hbm %s1297_s1, 8192 }
  0x22   : > { %p714_p0 = scmp.ne.s32.totalorder %s1297_s1, %s713_s9  ;;  %p720_p6 = scmp.lt.u32.totalorder %s713_s9, %s1297_s1 }
  0x24   : > { %p716_p4 = pnand %p715_p2, %p714_p0 }
  0x26   : > { %p717_p5 = pneg %p716_p4 }
  0x28   : > { %p722_p8 = pnand %p720_p6, %p717_p5 }
  0x2a   : > { %725 = shalt.err (!%p722_p8)
}
  0x2b   : > { %s726_s24 = scalar_lea.vmem %s146_s5, 8192  ;;  %p734_p7 = scmp.lt.s32.totalorder %s146_s5, %s146_s5 }
  0x2c   : > { %p727_p10 = scmp.ne.s32.totalorder %s146_s5, %s726_s24  ;;  %p735_p1 = scmp.lt.s32.totalorder %s726_s24, %s726_s24 }
  0x2e   : > { %p729_p12 = pnand %p727_p10, %p715_p2  ;;  %p736_p3 = por %p735_p1, %p734_p7 }
  0x30   : > { %p730_p9 = pneg %p729_p12 }
  0x32   : > { %p737_p11 = pnand %p736_p3, %p730_p9 }
  0x34   : > { %740 = shalt.err (!%p737_p11)
}
  0x35   : > { %s900_s4 = smov 256   ;;  %s901_s7 = smov 16  }
  0x36   : > { %603 = dma.hbm_to_vmem [thread:$0]  (!%p1019_p13), %s1297_s1, 8192, %s146_s5, [#allocation6], %s900_s4, %s900_s4, %s901_s7  }
  0x37   : > { %s29_s10 = sadd.s32 1, %s889_s20  ;;  %s32_s11 = sadd.s32 1, %s893_s21 }
  0x38   : > { %p30_p1 = scmp.ge.s32.totalorder %s29_s10, 2  ;;  %s39_s15 = sadd.s32 1, %s877_s17 }
  0x39   : > { %p46_p3 = scmp.ne.s32.totalorder %s877_s17, %s873_s16  ;;  %p47_p7 = scmp.eq.s32.totalorder %s897_s22, 0 }
  0x3a   : > { %s1321_s10 = smov (%p30_p1, %s29_s10), 0  ;;  %s1323_s11 = smov (!%p30_p1, %s32_s11), %s893_s21 }
  0x3b   : > { %1298 = sst [smem:[#allocation14_spill]] %s1321_s10  ;;  %s105_s6 = ssub.s32 %s889_s20, %s1321_s10 }
  0x3c   : > { %p34_p9 = scmp.ge.s32.totalorder %s1323_s11, 2  ;;  %p613_p11 = scmp.lt.s32.totalorder %s897_s22, 4 }
  0x3d   : > { %p1051_p13 = por %p47_p7, %p46_p3  ;;  %s162_s23 = sand.u32 1, %s877_s17  }
  0x3e   : > { %s1325_s11 = smov (%p34_p9, %s1323_s11), 0  ;;  %s525_s24 = sshll.u32 %s162_s23, 6 }
  0x3f   : > { %1300 = sst [smem:[#allocation15_spill]] %s1325_s11  ;;  %s36_s4 = ssub.s32 %s893_s21, %s1325_s11 }
  0x40   : > { %p37_p0 = scmp.eq.s32.totalorder %s36_s4, 0  ;;  %s106_s7 = sor.u32 %s105_s6, %s36_s4 }
  0x41   : > { %p107_p2 = scmp.eq.s32.totalorder %s106_s7, 0  ;;  %s541_s8 = sshll.u32 %s893_s21, 10 }
  0x42   : > { %s1062_s9 = scalar_select %p37_p0, %s877_s17, %s39_s15  }
  0x43   : > { %s1067_s1 = scalar_select %p107_p2, %s865_s14, %s109_s26  }
  0x44   : > { %s1072_s29 = scalar_lea.hbm %s1273_s0, %s541_s8  ;;  %s166_s12 = scalar_lea.vmem [#allocation2], %s525_s24 }
  0x45   : > { %s173_s11 = sshll.u32 %s166_s12, 4  ;;  %p1080_p4 = pnand %p613_p11, %p1051_p13  ;;  %s1074_s11 = int_to_ptr.vmem [resolvable:$true] %s173_s11 }
  0x46   : > { %s1084_s26 = scalar_lea.sflag [#allocation3], %s162_s23  ;;  %s741_s20 = scalar_lea.hbm %s1072_s29, 1024 }
  0x47   : > { %p742_p5 = scmp.ne.s32.totalorder %s1072_s29, %s741_s20  ;;  %p743_p6 = pneg %p1080_p4 }
  0x48   : > { %s746_s6 = scalar_lea.hbm %s1273_s0, 2048  ;;  %p747_p12 = scmp.lt.u32.totalorder %s1072_s29, %s1273_s0 }
  0x49   : > { %p744_p8 = pnand %p743_p6, %p742_p5  ;;  %p748_p1 = scmp.lt.u32.totalorder %s746_s6, %s741_s20 }
  0x4a   : > { %p750_p7 = scmp.lt.u32.totalorder %s741_s20, %s1072_s29 }
  0x4b   : > { %p745_p10 = pneg %p744_p8  ;;  %p749_p3 = por %p748_p1, %p747_p12 }
  0x4d   : > { %p751_p9 = por %p750_p7, %p749_p3 }
  0x4f   : > { %p752_p11 = pnand %p751_p9, %p745_p10 }
  0x51   : > { %755 = shalt.err (!%p752_p11)
}
  0x52   : > { %s756_s23 = scalar_lea.vmem %s1074_s11, 1024  ;;  %s902_s4 = smov [#allocation2]  }
  0x53   : > { %p757_p13 = scmp.ne.s32.totalorder %s1074_s11, %s756_s23  ;;  %s761_s7 = sshll.u32 %s902_s4, 4  ;;  %s762_s7 = int_to_ptr.vmem [resolvable:$false] %s761_s7 }
  0x54   : > { %s763_s8 = scalar_lea.vmem %s762_s7, 2048  ;;  %p764_p5 = scmp.lt.s32.totalorder %s1074_s11, %s762_s7 }
  0x55   : > { %p759_p0 = pnand %p757_p13, %p743_p6  ;;  %p765_p8 = scmp.lt.s32.totalorder %s763_s8, %s756_s23 }
  0x57   : > { %p760_p2 = pneg %p759_p0  ;;  %p766_p12 = por %p765_p8, %p764_p5 }
  0x59   : > { %p767_p1 = pnand %p766_p12, %p760_p2 }
  0x5b   : > { %770 = shalt.err (!%p767_p1)
}
  0x5c   : > { %s903_s20 = smov 128   ;;  %s904_s12 = smov 8  }
  0x5d   : > { %607 = dma.hbm_to_vmem [thread:$0]  (!%p1080_p4), %s1072_s29, 1024, %s1074_s11, %s1084_s26, %s903_s20, %s903_s20, %s904_s12  }
  0x5e   : > { %p1302_p6 = scmp.ne.s32.totalorder %s1295_s30, 0 }
  0x5f   : > { %s187_s10 = sand.u32 (!%p1302_p6), 1, %s873_s16   ;;  %p1303_p10 = scmp.ne.s32.totalorder (!%p1302_p6), %s1291_s27, 0 }
  0x60   : > { %185 = sbr.rel (%p1302_p6) target bundleno = 387 (0x183), region = 32  ;;  %s529_s6 = sshll.u32 (!%p1302_p6), %s187_s10, 6 }
  0x61   : > { %s188_s5 = scalar_lea.sflag (!%p1302_p6), [#allocation3], %s187_s10  ;;  %s1115_s24 = scalar_lea.vmem (!%p1302_p6), [#allocation2], %s529_s6 }
  0x67   : > { %844 = dma.done.wait (%p1303_p10), %s188_s5, 1024  }
  0x68   : > { %846 = vsyncadd (%p1303_p10), %s188_s5, 4294966272  ;;  %p1304_p3 = scmp.ne.s32.totalorder %s1290_s25, 0 }
  0x6a   : > { %848 = dma.done.wait (%p1304_p3), [#allocation6], 8192  }
  0x6b   : > { %850 = vsyncadd (%p1304_p3), [#allocation6], 4294959104  ;;  %s542_s29 = sshll.u32 %s881_s18, 8  ;;  %v905_v0 = vmov 0.0   ;;  %v220_v49 = vld [vmem:[%s1115_s24] sm:$0xff]  ;;  %v221_v51 = vld [vmem:[%s1115_s24 + $0x8] sm:$0xff]  ;;  %v265_v57 = vlaneseq }
  0x6c   : > { %339 = vmatprep.mubr.f32.mxu0 %v905_v0  ;;  %363 = vmatprep.mubr.f32.mxu1 %v905_v0  ;;  %s1128_s30 = scalar_lea.vmem [#allocation5], %s542_s29  ;;  %v224_v50 = vld [vmem:[%s1115_s24 + $0x20] sm:$0xff]  ;;  %v225_v52 = vld [vmem:[%s1115_s24 + $0x28] sm:$0xff]  ;;  %v222_v53 = vld [vmem:[%s1115_s24 + $0x10] sm:$0xff]  ;;  %s215_s25 = sand.u32 1, %s861_s13  }
  0x6d   : > { %v232_v1 = vld [vmem:[%s1128_s30 + $0x8] sm:$0xff]  ;;  %v234_v2 = vld [vmem:[%s1128_s30 + $0x18] sm:$0xff]  ;;  %v231_v3 = vld [vmem:[%s1128_s30] sm:$0xff]  ;;  %v266_v58 = vshrl.u32 %v265_v57, 7  ;;  %s531_s15 = sshll.u32 %s215_s25, 7  ;;  %s536_s23 = sshll.u32 %s881_s18, 1 }
  0x6e   : > { %v544_v4 = vpack.c.bf16 %v234_v2, %v232_v1  ;;  %v233_v5 = vld [vmem:[%s1128_s30 + $0x10] sm:$0xff]  ;;  %v236_v6 = vld [vmem:[%s1128_s30 + $0x28] sm:$0xff]  ;;  %v238_v7 = vld [vmem:[%s1128_s30 + $0x38] sm:$0xff]  ;;  %s1182_s26 = scalar_lea.vmem [#allocation7], %s531_s15  ;;  %s543_s4 = sshll.u32 %s885_s19, 5 }
  0x6f   : > { %v546_v8 = vpack.c.bf16 %v233_v5, %v231_v3  ;;  %v548_v9 = vpack.c.bf16 %v238_v7, %v236_v6  ;;  %v235_v10 = vld [vmem:[%s1128_s30 + $0x20] sm:$0xff]  ;;  %v237_v11 = vld [vmem:[%s1128_s30 + $0x30] sm:$0xff]  ;;  %v240_v12 = vld [vmem:[%s1128_s30 + $0x48] sm:$0xff]  ;;  %v267_v59 = vsub.s32 0, %v266_v58  ;;  %v271_v61 = vsub.s32 1, %v266_v58  ;;  %s418_s7 = sadd.s32 %s543_s4, %s536_s23  ;;  %s421_s19 = sshll.u32 %s1182_s26, 4  ;;  %s1204_s19 = int_to_ptr.vmem [resolvable:$true] %s421_s19 }
  0x70   : > { %545 = vmatprep.subr.bf16.mxu0 %v544_v4  ;;  %576 = vmatprep.subr.bf16.mxu1 %v544_v4  ;;  %v242_v13 = vld [vmem:[%s1128_s30 + $0x58] sm:$0xff]  ;;  %v550_v14 = vpack.c.bf16 %v237_v11, %v235_v10  ;;  %v239_v16 = vld [vmem:[%s1128_s30 + $0x40] sm:$0xff]  ;;  %v241_v17 = vld [vmem:[%s1128_s30 + $0x50] sm:$0xff]  ;;  %s538_s18 = sshll.u32 %s418_s7, 7  ;;  %s1212_s10 = scalar_lea.sflag [#allocation4], %s215_s25 }
  0x71   : > { %547 = vmatpush1.bf16.msra.mxu0 %v546_v8  ;;  %584 = vmatpush1.bf16.msra.mxu1 %v546_v8  ;;  %v552_v15 = vpack.c.bf16 %v242_v13, %v240_v12  ;;  %v244_v18 = vld [vmem:[%s1128_s30 + $0x68] sm:$0xff]  ;;  %v246_v19 = vld [vmem:[%s1128_s30 + $0x78] sm:$0xff]  ;;  %v554_v20 = vpack.c.bf16 %v241_v17, %v239_v16  ;;  %v243_v22 = vld [vmem:[%s1128_s30 + $0x60] sm:$0xff]  ;;  %s1202_s12 = scalar_lea.hbm %s1276_s3, %s538_s18  ;;  %s771_s6 = scalar_lea.vmem %s1204_s19, 2048 }
  0x72   : > { %549 = vmatprep.subr.bf16.mxu0 %v548_v9  ;;  %577 = vmatprep.subr.bf16.mxu1 %v548_v9  ;;  %v556_v21 = vpack.c.bf16 %v246_v19, %v244_v18  ;;  %v245_v23 = vld [vmem:[%s1128_s30 + $0x70] sm:$0xff]  ;;  %v248_v24 = vld [vmem:[%s1128_s30 + $0x88] sm:$0xff]  ;;  %v250_v25 = vld [vmem:[%s1128_s30 + $0x98] sm:$0xff]  ;;  %p772_p4 = scmp.ne.s32.totalorder %s1204_s19, %s771_s6  ;;  %p1305_p7 = scmp.ne.s32.totalorder %s1292_s28, 0 }
  0x73   : > { %v558_v26 = vpack.c.bf16 %v245_v23, %v243_v22  ;;  %v560_v27 = vpack.c.bf16 %v250_v25, %v248_v24  ;;  %v247_v28 = vld [vmem:[%s1128_s30 + $0x80] sm:$0xff]  ;;  %v249_v29 = vld [vmem:[%s1128_s30 + $0x90] sm:$0xff]  ;;  %v252_v30 = vld [vmem:[%s1128_s30 + $0xa8] sm:$0xff]  ;;  %s906_s5 = smov [#allocation7]  }
  0x74   : > { %v254_v31 = vld [vmem:[%s1128_s30 + $0xb8] sm:$0xff]  ;;  %v562_v32 = vpack.c.bf16 %v249_v29, %v247_v28  ;;  %v251_v34 = vld [vmem:[%s1128_s30 + $0xa0] sm:$0xff]  ;;  %v253_v35 = vld [vmem:[%s1128_s30 + $0xb0] sm:$0xff]  ;;  %p773_p9 = pnand %p772_p4, %p1305_p7 }
  0x75   : > { %551 = vmatpush1.bf16.msra.mxu0 %v550_v14  ;;  %585 = vmatpush1.bf16.msra.mxu1 %v550_v14  ;;  %v564_v33 = vpack.c.bf16 %v254_v31, %v252_v30  ;;  %v256_v36 = vld [vmem:[%s1128_s30 + $0xc8] sm:$0xff]  ;;  %v258_v37 = vld [vmem:[%s1128_s30 + $0xd8] sm:$0xff]  ;;  %v566_v38 = vpack.c.bf16 %v253_v35, %v251_v34  ;;  %v255_v40 = vld [vmem:[%s1128_s30 + $0xc0] sm:$0xff] }
  0x76   : > { %553 = vmatprep.subr.bf16.mxu0 %v552_v15  ;;  %578 = vmatprep.subr.bf16.mxu1 %v552_v15  ;;  %v568_v39 = vpack.c.bf16 %v258_v37, %v256_v36  ;;  %v257_v41 = vld [vmem:[%s1128_s30 + $0xd0] sm:$0xff]  ;;  %v260_v42 = vld [vmem:[%s1128_s30 + $0xe8] sm:$0xff]  ;;  %v262_v43 = vld [vmem:[%s1128_s30 + $0xf8] sm:$0xff]  ;;  %p774_p11 = pneg %p773_p9 }
  0x77   : > { %v570_v44 = vpack.c.bf16 %v257_v41, %v255_v40  ;;  %v572_v45 = vpack.c.bf16 %v262_v43, %v260_v42  ;;  %v259_v46 = vld [vmem:[%s1128_s30 + $0xe0] sm:$0xff]  ;;  %v261_v47 = vld [vmem:[%s1128_s30 + $0xf0] sm:$0xff]  ;;  %v223_v55 = vld [vmem:[%s1115_s24 + $0x18] sm:$0xff] }
  0x78   : > { %v574_v48 = vpack.c.bf16 %v261_v47, %v259_v46  ;;  %v226_v54 = vld [vmem:[%s1115_s24 + $0x30] sm:$0xff]  ;;  %v227_v56 = vld [vmem:[%s1115_s24 + $0x38] sm:$0xff]  ;;  %v263_v60 = vld [vmem:[%s1275_s2] sm:$0x3]  ;;  %s775_s24 = sshll.u32 %s906_s5, 4  ;;  %s776_s24 = int_to_ptr.vmem [resolvable:$false] %s775_s24 }
  0x79   : > { %555 = vmatpush1.bf16.msra.mxu0 %v554_v20  ;;  %586 = vmatpush1.bf16.msra.mxu1 %v554_v20  ;;  %v268_v62 = vrot.slane %v263_v60, %v267_v59  ;;  %v272_v63 = vrot.slane %v263_v60, %v271_v61  ;;  %s777_s29 = scalar_lea.vmem %s776_s24, 4096  ;;  %p778_p13 = scmp.lt.s32.totalorder %s1204_s19, %s776_s24 }
  0x7a   : > { %557 = vmatprep.subr.bf16.mxu0 %v556_v21  ;;  %579 = vmatprep.subr.bf16.mxu1 %v556_v21  ;;  %p779_p0 = scmp.lt.s32.totalorder %s777_s29, %s771_s6 }
  0x7c   : > { %p780_p2 = por %p779_p0, %p778_p13 }
  0x7d   : > { %559 = vmatpush1.bf16.msra.mxu0 %v558_v26  ;;  %587 = vmatpush1.bf16.msra.mxu1 %v558_v26 }
  0x7e   : > { %561 = vmatprep.subr.bf16.mxu0 %v560_v27  ;;  %580 = vmatprep.subr.bf16.mxu1 %v560_v27  ;;  %p781_p5 = pnand %p780_p2, %p774_p11 }
  0x81   : > { %563 = vmatpush1.bf16.msra.mxu0 %v562_v32  ;;  %588 = vmatpush1.bf16.msra.mxu1 %v562_v32 }
  0x82   : > { %565 = vmatprep.subr.bf16.mxu0 %v564_v33  ;;  %581 = vmatprep.subr.bf16.mxu1 %v564_v33 }
  0x85   : > { %567 = vmatpush1.bf16.msra.mxu0 %v566_v38  ;;  %589 = vmatpush1.bf16.msra.mxu1 %v566_v38 }
  0x86   : > { %569 = vmatprep.subr.bf16.mxu0 %v568_v39  ;;  %582 = vmatprep.subr.bf16.mxu1 %v568_v39 }
  0x89   : > { %571 = vmatpush1.bf16.msra.mxu0 %v570_v44  ;;  %590 = vmatpush1.bf16.msra.mxu1 %v570_v44 }
  0x8a   : > { %573 = vmatprep.subr.bf16.mxu0 %v572_v45  ;;  %583 = vmatprep.subr.bf16.mxu1 %v572_v45 }
  0x8d   : > { %575 = vmatpush1.bf16.msra.mxu0 %v574_v48  ;;  %591 = vmatpush1.bf16.msra.mxu1 %v574_v48 }
  0x90   : > { %340 = vmatmul.mubr.f32.vlgmr.msra.gmra.mrb[0].mxu0 %v220_v49  ;;  %364 = vmatmul.mubr.f32.vlgmr.msra.gmra.mrb[0].mxu1 %v224_v50 }
  0x91   : > { %345 = vmatprep.mubr.f32.mxu0 %v905_v0  ;;  %369 = vmatprep.mubr.f32.mxu1 %v905_v0 }
  0x94   : > { %346 = vmatmul.mubr.f32.gmra.mrb[2].mxu0 %v221_v51  ;;  %370 = vmatmul.mubr.f32.gmra.mrb[2].mxu1 %v225_v52 }
  0x95   : > { %351 = vmatprep.mubr.f32.mxu0 %v905_v0  ;;  %375 = vmatprep.mubr.f32.mxu1 %v905_v0 }
  0x98   : > { %352 = vmatmul.mubr.f32.gmra.mrb[4].mxu0 %v222_v53  ;;  %376 = vmatmul.mubr.f32.gmra.mrb[4].mxu1 %v226_v54 }
  0x99   : > { %357 = vmatprep.mubr.f32.mxu0 %v905_v0  ;;  %381 = vmatprep.mubr.f32.mxu1 %v905_v0 }
  0x9c   : > { %358 = vmatmul.mubr.f32.gmra.mrb[6].mxu0 %v223_v55  ;;  %382 = vmatmul.mubr.f32.gmra.mrb[6].mxu1 %v227_v56 }
 0x163   : > { %v341_v0 = vpop.f32.mrb[0].mxu0  ;;  %v365_v1 = vpop.f32.mrb[0].mxu1 }
 0x164   : > { %v342_v2 = vadd.f32 %v341_v0, %v268_v62  ;;  %v366_v3 = vadd.f32 %v365_v1, %v268_v62  ;;  %v343_v4 = vpop.f32.mrb[1].mxu0  ;;  %v367_v5 = vpop.f32.mrb[1].mxu1 }
 0x165   : > { %v344_v6 = vadd.f32 %v343_v4, %v272_v63  ;;  %v368_v7 = vadd.f32 %v367_v5, %v272_v63 }
 0x166   : > { %388 = vst [vmem:[%s1182_s26] sm:$0xff] %v342_v2  ;;  %396 = vst [vmem:[%s1182_s26 + $0x40] sm:$0xff] %v366_v3 }
 0x167   : > { %389 = vst [vmem:[%s1182_s26 + $0x8] sm:$0xff] %v344_v6  ;;  %397 = vst [vmem:[%s1182_s26 + $0x48] sm:$0xff] %v368_v7  ;;  %v347_v8 = vpop.f32.mrb[2].mxu0  ;;  %v371_v9 = vpop.f32.mrb[2].mxu1 }
 0x168   : > { %v348_v10 = vadd.f32 %v347_v8, %v268_v62  ;;  %v372_v11 = vadd.f32 %v371_v9, %v268_v62  ;;  %v349_v12 = vpop.f32.mrb[3].mxu0  ;;  %v373_v13 = vpop.f32.mrb[3].mxu1 }
 0x169   : > { %v350_v14 = vadd.f32 %v349_v12, %v272_v63  ;;  %v374_v15 = vadd.f32 %v373_v13, %v272_v63 }
 0x16a   : > { %390 = vst [vmem:[%s1182_s26 + $0x10] sm:$0xff] %v348_v10  ;;  %398 = vst [vmem:[%s1182_s26 + $0x50] sm:$0xff] %v372_v11 }
 0x16b   : > { %391 = vst [vmem:[%s1182_s26 + $0x18] sm:$0xff] %v350_v14  ;;  %399 = vst [vmem:[%s1182_s26 + $0x58] sm:$0xff] %v374_v15  ;;  %v353_v16 = vpop.f32.mrb[4].mxu0  ;;  %v377_v17 = vpop.f32.mrb[4].mxu1 }
 0x16c   : > { %v354_v18 = vadd.f32 %v353_v16, %v268_v62  ;;  %v378_v19 = vadd.f32 %v377_v17, %v268_v62  ;;  %v355_v20 = vpop.f32.mrb[5].mxu0  ;;  %v379_v21 = vpop.f32.mrb[5].mxu1 }
 0x16d   : > { %v356_v22 = vadd.f32 %v355_v20, %v272_v63  ;;  %v380_v23 = vadd.f32 %v379_v21, %v272_v63 }
 0x16e   : > { %392 = vst [vmem:[%s1182_s26 + $0x20] sm:$0xff] %v354_v18  ;;  %400 = vst [vmem:[%s1182_s26 + $0x60] sm:$0xff] %v378_v19 }
 0x16f   : > { %393 = vst [vmem:[%s1182_s26 + $0x28] sm:$0xff] %v356_v22  ;;  %401 = vst [vmem:[%s1182_s26 + $0x68] sm:$0xff] %v380_v23  ;;  %v359_v24 = vpop.f32.mrb[6].mxu0  ;;  %v383_v25 = vpop.f32.mrb[6].mxu1 }
 0x170   : > { %v360_v26 = vadd.f32 %v359_v24, %v268_v62  ;;  %v384_v27 = vadd.f32 %v383_v25, %v268_v62  ;;  %v361_v28 = vpop.f32.mrb[7].mxu0  ;;  %v385_v29 = vpop.f32.mrb[7].mxu1 }
 0x171   : > { %v362_v30 = vadd.f32 %v361_v28, %v272_v63  ;;  %v386_v31 = vadd.f32 %v385_v29, %v272_v63 }
 0x172   : > { %394 = vst [vmem:[%s1182_s26 + $0x30] sm:$0xff] %v360_v26  ;;  %402 = vst [vmem:[%s1182_s26 + $0x70] sm:$0xff] %v384_v27 }
 0x173   : > { %395 = vst [vmem:[%s1182_s26 + $0x38] sm:$0xff] %v362_v30  ;;  %403 = vst [vmem:[%s1182_s26 + $0x78] sm:$0xff] %v386_v31 }
 0x174   : > { %784 = shalt.err (!%p781_p5)
}
 0x175   : > { %s785_s30 = scalar_lea.hbm %s1202_s12, 2048  ;;  %s789_s11 = scalar_lea.hbm %s1276_s3, 8192 }
 0x176   : > { %p786_p8 = scmp.ne.s32.totalorder %s1202_s12, %s785_s30  ;;  %p790_p6 = scmp.lt.u32.totalorder %s1202_s12, %s1276_s3 }
 0x177   : > { %p791_p10 = scmp.lt.u32.totalorder %s789_s11, %s785_s30  ;;  %p793_p4 = scmp.lt.u32.totalorder %s785_s30, %s1202_s12 }
 0x178   : > { %p787_p12 = pnand %p786_p8, %p1305_p7 }
 0x179   : > { %p792_p3 = por %p791_p10, %p790_p6 }
 0x17a   : > { %p788_p1 = pneg %p787_p12 }
 0x17b   : > { %p794_p9 = por %p793_p4, %p792_p3 }
 0x17d   : > { %p795_p11 = pnand %p794_p9, %p788_p1 }
 0x17f   : > { %798 = shalt.err (!%p795_p11)
}
 0x180   : > { %s907_s23 = smov 256   ;;  %s908_s4 = smov 512  }
 0x181   : > { %s909_s7 = smov 16  }
 0x182   : > { %598 = dma.vmem_to_hbm [thread:$0]  (%p1305_p7), %s1204_s19, 2048, %s1202_s12, %s1212_s10, %s907_s23, %s908_s4, %s909_s7  }
 0x183 PF: > { %s1306_s18 = sld [smem:[#allocation11_spill]]  ;;  %s1307_s8 = sld [smem:[#allocation13_spill]] }
 0x184   : > { %p615_p13 = scmp.ge.s32.totalorder %s897_s22, 2 }
 0x189   : > { %s436_s20 = sand.u32 1, %s1306_s18   ;;  %p1308_p0 = scmp.ne.s32.totalorder %s1307_s8, 0 }
 0x18a   : > { %s437_s6 = scalar_lea.sflag [#allocation4], %s436_s20 }
 0x18b   : > { %p609_p2 = pnand %p615_p13, %p1308_p0 }
 0x18d   : > { %852 = dma.done.wait (!%p609_p2), %s437_s6, 2048  }
 0x18e   : > { %854 = vsyncadd (!%p609_p2), %s437_s6, 4294965248  ;;  %s20_s22 = sadd.s32 1, %s897_s22   ;;  %s1309_s18 = sld [smem:[#allocation12_spill]] }
 0x18f   : > { %p17_p5 = scmp.ge.s32.totalorder %s20_s22, 6   ;;  %s1310_s20 = sld [smem:[#allocation14_spill]] }
 0x190   : > { %s1311_s28 = sld [smem:[#allocation15_spill]]  ;;  %s1312_s12 = smov %s861_s13 }
 0x191   : > { %s1313_s13 = smov %s865_s14  ;;  %s1314_s14 = smov %s1067_s1 }
 0x192   : > { %s1315_s15 = smov %s873_s16  ;;  %s1316_s16 = smov %s877_s17 }
 0x193   : > { %s1317_s17 = smov %s1062_s9  ;;  %s1318_s19 = smov %s893_s21 }
 0x194   :  { %19 = sbr.rel (!%p17_p5) target bundleno = 12 (0xc), region = 82 }
 0x196   : > { %s1319_s21 = smov %s1311_s28 }
 0x19b   :  { %442 = vsyncpa [#allocation3], 1 }
 0x19c   :  { %444 = vsyncpa [#allocation3 + $0x1], 1 }
 0x19d   :  { %445 = vsyncpa [#allocation6], 1 }
 0x19e   :  { %446 = vsyncpa [#allocation4], 1 }
 0x19f   :  { %448 = vsyncpa [#allocation4 + $0x1], 1 }

</bundles_post_ra>
